<compile_context>
chip_gen: v5e
topology: v5e:2x2
jax: 0.10.0
libtpu: 0.0.40
codegen_flags: <defaults>
</compile_context>

<pallas_src>
import math

import jax
import jax.numpy as jnp
from jax.experimental import pallas as pl
from jax.experimental.pallas import tpu as pltpu


_LANE = 128
_SUBLANE = 8
_F32 = 4
_MAX_BLOCK_B = 1024


def _round_up(x, m):
    return (x + m - 1) // m * m


def _round_down(x, m):
    return (x // m) * m


def _vmem_capacity_bytes():
    """Physical per-core VMEM; conservative default (v7x) if the query is unavailable."""
    try:
        cap = getattr(pltpu.get_tpu_info(), "vmem_capacity_bytes", None)
        if cap:
            return int(cap)
    except Exception:
        pass
    return 64 * 1024 * 1024  # v7x per-TC VMEM == smallest of v5e/v6e/v7x


def _choose_tiles(B, D, C, w_itemsize):
    """Pick (block_b, block_c, capacity). All parameters stay VMEM-resident when they fit."""
    cap = _vmem_capacity_bytes()
    budget = int(cap * 0.7)  # headroom for Mosaic internal scratch / regalloc spills

    # Class tiling: keep the (double-buffered) weight tile under ~40% of the budget.
    w_full = 2 * D * C * w_itemsize
    if C <= _LANE or w_full <= 0.4 * budget:
        block_c = C
    else:
        block_c = _round_down(int(0.4 * budget) // (2 * D * w_itemsize), _LANE)
        block_c = max(_LANE, min(block_c, max(_LANE, _round_down(C, _LANE))))

    # Resident parameters (gamma, beta, W^T tile, bias), double-buffered by the pipeline.
    param_bytes = 2 * (2 * D * _F32 + D * block_c * w_itemsize + block_c * _F32)
    # Per-row cost: double-buffered x & out tiles + in-kernel f32 temporaries (~3x D + 1x C).
    per_row = 2 * _F32 * D + 2 * _F32 * block_c + 3 * _F32 * D + _F32 * block_c

    avail = budget - param_bytes
    if avail < _SUBLANE * per_row:
        block_b = _SUBLANE  # minimum legal tile; vmem_limit is bumped to actual need below
    else:
        block_b = min(_MAX_BLOCK_B, avail // per_row)

    # Give a 2-TC chip (v7x) at least two batch steps to shard across cores.
    if B >= 2 * _SUBLANE:
        block_b = min(block_b, _round_up(pl.cdiv(B, 2), _SUBLANE))

    if B <= block_b:
        block_b = B  # block dim == full array dim is always legal; no padding at all
    else:
        block_b = max(_SUBLANE, _round_down(int(block_b), _SUBLANE))

    return int(block_b), int(block_c), cap


def _make_kernel(d_true):
    inv_d = 1.0 / float(d_true)
    inv_sqrt2 = 1.0 / math.sqrt(2.0)

    def kernel(x_ref, gamma_ref, beta_ref, w_ref, b_ref, o_ref):
        # x_ref: (TB, D); gamma/beta: (1, D); w_ref: (D, TC) bf16; b_ref: (1, TC); o_ref: (TB, TC)
        x = x_ref[...].astype(jnp.float32)

        # One-pass LayerNorm statistics (eps = 1e-5, biased variance, PyTorch default).
        s1 = jnp.sum(x, axis=-1, keepdims=True)
        s2 = jnp.sum(x * x, axis=-1, keepdims=True)
        mean = s1 * inv_d
        var = jnp.maximum(s2 * inv_d - mean * mean, 0.0)
        xn = (x - mean) * jax.lax.rsqrt(var + 1e-5)
        h = xn * gamma_ref[...] + beta_ref[...]

        # Exact GELU (nn.GELU default, approximate='none'); erf/rsqrt land on the idle EUP.
        g = 0.5 * h * (1.0 + jax.lax.erf(h * inv_sqrt2))

        # Dropout(0.2): identity in eval mode.

        # Linear: y = g @ W^T + b ; bf16 operands, f32 accumulation on the MXU.
        y = jnp.dot(g.astype(w_ref.dtype), w_ref[...],
                    preferred_element_type=jnp.float32) + b_ref[...]
        o_ref[...] = y.astype(o_ref.dtype)

    return kernel


def prepare_params(gamma, beta, weight, bias, *, weight_dtype=jnp.bfloat16):
    """One-time parameter prep (hoisted out of the per-call hot path)."""
    C, D = weight.shape
    gamma2 = jnp.asarray(gamma, jnp.float32).reshape(1, D)
    beta2 = jnp.asarray(beta, jnp.float32).reshape(1, D)
    w_t = jnp.asarray(weight, jnp.float32).T.astype(weight_dtype)  # (D, C)
    bias2 = jnp.asarray(bias, jnp.float32).reshape(1, C)
    return gamma2, beta2, w_t, bias2


def improved_classifier_apply(x, params, *, block_b=None, block_c=None):
    """x: (B, D); params from prepare_params. Returns (B, C) in x.dtype."""
    gamma2, beta2, w_t, bias2 = params
    B, D = x.shape
    C = w_t.shape[1]
    w_itemsize = jnp.dtype(w_t.dtype).itemsize

    tb, tc, cap = _choose_tiles(B, D, C, w_itemsize)
    if block_b is not None:
        tb = min(int(block_b), B)
    if block_c is not None:
        tc = min(int(block_c), C)

    grid = (pl.cdiv(B, tb), pl.cdiv(C, tc))

    in_specs = [
        pl.BlockSpec((tb, D), lambda i, j: (i, 0)),   # x: tiled over batch, constant in classes
        pl.BlockSpec((1, D), lambda i, j: (0, 0)),    # gamma: resident
        pl.BlockSpec((1, D), lambda i, j: (0, 0)),    # beta: resident
        pl.BlockSpec((D, tc), lambda i, j: (0, j)),   # W^T: resident when tc == C
        pl.BlockSpec((1, tc), lambda i, j: (0, j)),   # bias
    ]
    out_specs = pl.BlockSpec((tb, tc), lambda i, j: (i, j))

    # VMEM accounting: double-buffered tiles + resident params + in-kernel f32 temporaries.
    tile_bytes = 2 * tb * D * _F32 + 2 * tb * tc * _F32
    param_bytes = 2 * (2 * D * _F32 + D * tc * w_itemsize + tc * _F32)
    temp_bytes = tb * (3 * D + tc) * _F32
    need = tile_bytes + param_bytes + temp_bytes + (4 << 20)
    vmem_limit = int(min(max(need, 32 << 20), int(cap * 0.9)))

    return pl.pallas_call(
        _make_kernel(D),
        out_shape=jax.ShapeDtypeStruct((B, C), x.dtype),
        grid=grid,
        in_specs=in_specs,
        out_specs=out_specs,
        compiler_params=pltpu.CompilerParams(
            dimension_semantics=("parallel", "parallel"),
            vmem_limit_bytes=vmem_limit,
        ),
    )(x, gamma2, beta2, w_t, bias2)


def improved_classifier(x, gamma, beta, weight, bias, **kwargs):
    """Convenience wrapper (prep + apply). Prefer calling prepare_params once for repeated use."""
    return improved_classifier_apply(x, prepare_params(gamma, beta, weight, bias), **kwargs)


def _reference(x, gamma, beta, weight, bias, weight_dtype=jnp.float32):
    mean = jnp.mean(x, axis=-1, keepdims=True)
    var = jnp.mean((x - mean) ** 2, axis=-1, keepdims=True)
    xn = (x - mean) / jnp.sqrt(var + 1e-5)
    h = xn * gamma + beta
    g = 0.5 * h * (1.0 + jax.lax.erf(h / jnp.sqrt(2.0)))
    y = jnp.dot(g.astype(weight_dtype), weight.T.astype(weight_dtype),
                preferred_element_type=jnp.float32)
    return y + bias


if __name__ == "__main__":
    key = jax.random.PRNGKey(0)
    B, D, C = 4, 32, 8  # batch, input_dim, num_classes

    k_x, k_w, k_b = jax.random.split(key, 3)
    x = jax.random.normal(k_x, (B, D), dtype=jnp.float32)

    # Deterministic params (LayerNorm: gamma=1, beta=0; Linear: uniform(-1/sqrt(D), 1/sqrt(D)))
    gamma = jnp.ones((D,), dtype=jnp.float32)
    beta = jnp.zeros((D,), dtype=jnp.float32)
    bound = 1.0 / math.sqrt(D)
    weight = jax.random.uniform(k_w, (C, D), minval=-bound, maxval=bound, dtype=jnp.float32)
    bias = jax.random.uniform(k_b, (C,), minval=-bound, maxval=bound, dtype=jnp.float32)

    params = prepare_params(gamma, beta, weight, bias)  # hoisted, one-time prep
    out = improved_classifier_apply(x, params)
    out = jax.block_until_ready(out)

    assert out.shape == (B, C)
    # Kernel uses bf16 weights/activations into the MXU with f32 accumulation: compare against
    # the matching bf16 reference tightly, and the pure-f32 reference loosely.
    ref_bf16 = _reference(x, gamma, beta, weight, bias, weight_dtype=jnp.bfloat16)
    ref_f32 = _reference(x, gamma, beta, weight, bias, weight_dtype=jnp.float32)
    assert jnp.allclose(out, ref_bf16, atol=1e-4, rtol=1e-4), "mismatch vs bf16 reference"
    assert jnp.allclose(out, ref_f32, atol=5e-2, rtol=5e-2), "mismatch vs f32 reference"

    print("KERNEL_OK")
</pallas_src>

<mosaic_0001>
module attributes {stable_mosaic.version = 11 : i64} {
  func.func @kernel(%arg0: i32, %arg1: i32, %arg2: memref<4x32xf32, #tpu.memory_space<vmem>>, %arg3: memref<1x32xf32, #tpu.memory_space<vmem>>, %arg4: memref<1x32xf32, #tpu.memory_space<vmem>>, %arg5: memref<32x8xbf16, #tpu.memory_space<vmem>>, %arg6: memref<1x8xf32, #tpu.memory_space<vmem>>, %arg7: memref<4x8xf32, #tpu.memory_space<vmem>>) attributes {dimension_semantics = [#tpu.dimension_semantics<parallel>, #tpu.dimension_semantics<parallel>], iteration_bounds = array<i64: 1, 1>, scalar_prefetch = 0 : i64, scratch_operands = 0 : i64, tpu.core_type = #tpu.core_type<tc>, window_params = [{transform_indices = @transform_0, window_bounds = array<i64: 4, 32>}, {pipeline_mode = #tpu.pipeline_mode<synchronous>, transform_indices = @transform_1, window_bounds = array<i64: 1, 32>}, {pipeline_mode = #tpu.pipeline_mode<synchronous>, transform_indices = @transform_2, window_bounds = array<i64: 1, 32>}, {transform_indices = @transform_3, window_bounds = array<i64: 32, 8>}, {transform_indices = @transform_4, window_bounds = array<i64: 1, 8>}, {transform_indices = @transform_5, window_bounds = array<i64: 4, 8>}]} {
    %c0 = arith.constant 0 : index
    %c0_0 = arith.constant 0 : index
    %0 = vector.load %arg2[%c0, %c0_0] : memref<4x32xf32, #tpu.memory_space<vmem>>, vector<4x32xf32>
    %cst = arith.constant dense<0.000000e+00> : vector<4xf32>
    %1 = vector.multi_reduction <add>, %0, %cst [1] : vector<4x32xf32> to vector<4xf32>
    %2 = vector.shape_cast %1 : vector<4xf32> to vector<4x1xf32>
    %3 = arith.mulf %0, %0 : vector<4x32xf32>
    %cst_1 = arith.constant dense<0.000000e+00> : vector<4xf32>
    %4 = vector.multi_reduction <add>, %3, %cst_1 [1] : vector<4x32xf32> to vector<4xf32>
    %5 = vector.shape_cast %4 : vector<4xf32> to vector<4x1xf32>
    %cst_2 = arith.constant 3.125000e-02 : f32
    %6 = vector.broadcast %cst_2 : f32 to vector<4x1xf32>
    %7 = arith.mulf %2, %6 : vector<4x1xf32>
    %cst_3 = arith.constant 3.125000e-02 : f32
    %8 = vector.broadcast %cst_3 : f32 to vector<4x1xf32>
    %9 = arith.mulf %5, %8 : vector<4x1xf32>
    %10 = arith.mulf %7, %7 : vector<4x1xf32>
    %11 = arith.subf %9, %10 : vector<4x1xf32>
    %cst_4 = arith.constant 0.000000e+00 : f32
    %12 = vector.broadcast %cst_4 : f32 to vector<4x1xf32>
    %13 = arith.maximumf %11, %12 : vector<4x1xf32>
    %14 = vector.broadcast %7 : vector<4x1xf32> to vector<4x32xf32>
    %15 = arith.subf %0, %14 : vector<4x32xf32>
    %cst_5 = arith.constant 9.99999974E-6 : f32
    %16 = vector.broadcast %cst_5 : f32 to vector<4x1xf32>
    %17 = arith.addf %13, %16 : vector<4x1xf32>
    %18 = math.rsqrt %17 : vector<4x1xf32>
    %19 = vector.broadcast %18 : vector<4x1xf32> to vector<4x32xf32>
    %20 = arith.mulf %15, %19 : vector<4x32xf32>
    %c0_6 = arith.constant 0 : index
    %c0_7 = arith.constant 0 : index
    %21 = vector.load %arg3[%c0_6, %c0_7] : memref<1x32xf32, #tpu.memory_space<vmem>>, vector<1x32xf32>
    %22 = vector.broadcast %21 : vector<1x32xf32> to vector<4x32xf32>
    %23 = arith.mulf %20, %22 : vector<4x32xf32>
    %c0_8 = arith.constant 0 : index
    %c0_9 = arith.constant 0 : index
    %24 = vector.load %arg4[%c0_8, %c0_9] : memref<1x32xf32, #tpu.memory_space<vmem>>, vector<1x32xf32>
    %25 = vector.broadcast %24 : vector<1x32xf32> to vector<4x32xf32>
    %26 = arith.addf %23, %25 : vector<4x32xf32>
    %cst_10 = arith.constant 5.000000e-01 : f32
    %27 = vector.broadcast %cst_10 : f32 to vector<4x32xf32>
    %28 = arith.mulf %27, %26 : vector<4x32xf32>
    %cst_11 = arith.constant 0.707106769 : f32
    %29 = vector.broadcast %cst_11 : f32 to vector<4x32xf32>
    %30 = arith.mulf %26, %29 : vector<4x32xf32>
    %31 = math.erf %30 : vector<4x32xf32>
    %cst_12 = arith.constant 1.000000e+00 : f32
    %32 = vector.broadcast %cst_12 : f32 to vector<4x32xf32>
    %33 = arith.addf %32, %31 : vector<4x32xf32>
    %34 = arith.mulf %28, %33 : vector<4x32xf32>
    %35 = arith.truncf %34 : vector<4x32xf32> to vector<4x32xbf16>
    %c0_13 = arith.constant 0 : index
    %c0_14 = arith.constant 0 : index
    %36 = vector.load %arg5[%c0_13, %c0_14] : memref<32x8xbf16, #tpu.memory_space<vmem>>, vector<32x8xbf16>
    %cst_15 = arith.constant dense<0.000000e+00> : vector<4x8xf32>
    %37 = tpu.matmul %35, %36, %cst_15 {dimension_numbers = #tpu.dot_dimension_numbers<[1], [0], [0], [1], [0, 0, 1, 1], [], []>} : vector<4x32xbf16>, vector<32x8xbf16>, vector<4x8xf32> -> vector<4x8xf32>
    %c0_16 = arith.constant 0 : index
    %c0_17 = arith.constant 0 : index
    %38 = vector.load %arg6[%c0_16, %c0_17] : memref<1x8xf32, #tpu.memory_space<vmem>>, vector<1x8xf32>
    %39 = vector.broadcast %38 : vector<1x8xf32> to vector<4x8xf32>
    %40 = arith.addf %37, %39 : vector<4x8xf32>
    %c0_18 = arith.constant 0 : index
    %c0_19 = arith.constant 0 : index
    %41 = vector.load %arg7[%c0_18, %c0_19] : memref<4x8xf32, #tpu.memory_space<vmem>>, vector<4x8xf32>
    tpu.vector_store %arg7[%c0_18, %c0_19], %40 {strides = array<i32>} : memref<4x8xf32, #tpu.memory_space<vmem>>, vector<4x8xf32>,
    return
  }
  func.func @transform_0(%arg0: i32, %arg1: i32) -> (i32, i32) {
    %c0_i32 = arith.constant 0 : i32
    %c0_i32_0 = arith.constant 0 : i32
    return %arg0, %c0_i32 : i32, i32
  }
  func.func @transform_1(%arg0: i32, %arg1: i32) -> (i32, i32) {
    %c0_i32 = arith.constant 0 : i32
    %c0_i32_0 = arith.constant 0 : i32
    %c0_i32_1 = arith.constant 0 : i32
    return %c0_i32, %c0_i32_0 : i32, i32
  }
  func.func @transform_2(%arg0: i32, %arg1: i32) -> (i32, i32) {
    %c0_i32 = arith.constant 0 : i32
    %c0_i32_0 = arith.constant 0 : i32
    %c0_i32_1 = arith.constant 0 : i32
    return %c0_i32, %c0_i32_0 : i32, i32
  }
  func.func @transform_3(%arg0: i32, %arg1: i32) -> (i32, i32) {
    %c0_i32 = arith.constant 0 : i32
    %c0_i32_0 = arith.constant 0 : i32
    return %c0_i32, %arg1 : i32, i32
  }
  func.func @transform_4(%arg0: i32, %arg1: i32) -> (i32, i32) {
    %c0_i32 = arith.constant 0 : i32
    %c0_i32_0 = arith.constant 0 : i32
    return %c0_i32, %arg1 : i32, i32
  }
  func.func @transform_5(%arg0: i32, %arg1: i32) -> (i32, i32) {
    %c0_i32 = arith.constant 0 : i32
    return %arg0, %arg1 : i32, i32
  }
}

</mosaic_0001>

<bundles_post_ra>
// kernel: tpu_custom_call.1
= control target key start
LH: loop header
LB: loop body
LE: loop exit
PB: predicated region body
PF: predicated region fallthrough
CT: control target
= control target key end

     0   :  { %vm23_vm0 = vcmask 257024   ;;  %s257_s0 = inlined_call_operand.vmem [shape: f32[4,32], index: 0, kind: input, shape index: {}]   ;;  %s258_s1 = inlined_call_operand.vmem [shape: f32[1,32], index: 1, kind: input, shape index: {}]   ;;  %s259_s2 = inlined_call_operand.vmem [shape: f32[1,32], index: 2, kind: input, shape index: {}]   ;;  %s260_s3 = inlined_call_operand.vmem [shape: bf16[32,8], index: 3, kind: input, shape index: {}]   ;;  %s261_s4 = inlined_call_operand.vmem [shape: f32[1,8], index: 4, kind: input, shape index: {}]   ;;  %s262_s5 = inlined_call_operand.hbm [shape: f32[4,8], index: 5, kind: output, shape index: {}]  }
   0x1   :  { %v22_v0 = vld [vmem:[%s257_s0] sm:$0xf] }
   0x2   :  { %v24_v1 = vsel %vm23_vm0, %v22_v0, 0.0 }
   0x3   :  { %25 = vadd.xlane.f32.xlu0 %v24_v1 }
   0x4   :  { %10 = vsyncpa [#allocation3], 0  ;;  %v27_v2 = vmul.f32 %v22_v0, %v22_v0  ;;  %v170_v5 = vld [vmem:[%s260_s3 + $0x8] sm:$0xff]  ;;  %v169_v7 = vld [vmem:[%s260_s3] sm:$0xff]  ;;  %vm124_vm8 = vcmask 261120   ;;  %s205_s26 = smov [#allocation2]  }
   0x5   :  { %134 = vmatpush.bf16.msra.mxu0 %v170_v5  ;;  %v172_v21 = vld [vmem:[%s258_s1] ss:$0 sm:$0xff]  ;;  %s148_s27 = sshll.u32 %s205_s26, 4  ;;  %s150_s30 = sshll.u32 %s262_s5, 4  ;;  %vm141_vm9 = vcmask 60416   ;;  %s149_s27 = int_to_ptr.vmem [resolvable:$true] %s148_s27  ;;  %s151_s30 = int_to_ptr.hbm [resolvable:$true] %s150_s30 }
   0x6   :  { %v28_v3 = vsel %vm23_vm0, %v27_v2, 0.0  ;;  %v173_v24 = vld [vmem:[%s259_s2] ss:$0 sm:$0xff] }
   0x9   :  { %135 = vmatpush.bf16.msra.mxu0 %v169_v7 }
   0xb   :  { %29 = vadd.xlane.f32.xlu0 %v28_v3  ;;  %v174_v3 = vld [vmem:[%s261_s4] ss:$0 sm:$0xff] }
  0x76   :  { %v26_v4 = vpop.xlane.xlu0 %25 }
  0x77   :  { %v31_v6 = vmul.f32 0.03125, %v26_v4 }
  0x79   :  { %v33_v9 = vmul.f32 %v31_v6, %v31_v6  ;;  %v36_v20 = vsub.f32 %v22_v0, %v31_v6 }
  0x7e   :  { %v30_v8 = vpop.xlane.xlu0 %29 }
  0x7f   :  { %v32_v10 = vmul.f32 0.03125, %v30_v8 }
  0x81   :  { %v34_v11 = vsub.f32 %v32_v10, %v33_v9 }
  0x83   :  { %v35_v12 = vmax.f32 %v34_v11, 0.0 }
  0x85   :  { %v37_v13 = vadd.f32 1e-05, %v35_v12 }
  0x87   :  { %175 = vrsqrt.f32 %v37_v13  ;;  %vm44_vm2 = vweird.f32 %v37_v13 }
  0x8d   :  { %v176_v14 = vpop.eup %175 }
  0x8e   :  { %v39_v15 = vmul.f32 %v176_v14, %v37_v13  ;;  %vm45_vm1 = vweird.f32 %v176_v14 }
  0x8f   :  { %vm46_vm3 = vmor %vm44_vm2, %vm45_vm1 }
  0x90   :  { %v40_v16 = vmul.f32 %v176_v14, %v39_v15 }
  0x92   :  { %v41_v17 = vmul.f32 0.5, %v40_v16 }
  0x94   :  { %v42_v18 = vsub.f32 1.5, %v41_v17 }
  0x96   :  { %v43_v19 = vmul.f32 %v176_v14, %v42_v18 }
  0x98   :  { %v47_v22 = vsel %vm46_vm3, %v176_v14, %v43_v19 }
  0x99   :  { %v48_v23 = vmul.f32 %v47_v22, %v36_v20 }
  0x9b   :  { %v53_v25 = vmul.f32 %v172_v21, %v48_v23 }
  0x9d   :  { %v58_v26 = vadd.f32 %v173_v24, %v53_v25 }
  0x9f   :  { %v60_v27 = vmul.f32 0.70710677, %v58_v26  ;;  %v59_v63 = vmul.f32 0.5, %v58_v26 }
  0xa1   :  { %v61_v28 = vmul.f32 %v60_v27, %v60_v27 }
  0xa3   :  { %v62_v29 = vmin.f32 %v61_v28, 16.0 }
  0xa5   :  { %v63_v30 = vmul.f32 2.1237322e-06, %v62_v29  ;;  %v74_v31 = vmul.f32 3.8918573e-05, %v62_v29 }
  0xa7   :  { %v64_v32 = vadd.f32 0.00028619796, %v63_v30  ;;  %v75_v33 = vadd.f32 0.001143296, %v74_v31 }
  0xa9   :  { %v65_v34 = vmul.f32 %v64_v32, %v62_v29  ;;  %v76_v35 = vmul.f32 %v75_v33, %v62_v29 }
  0xab   :  { %v77_v36 = vadd.f32 0.014752088, %v76_v35  ;;  %v66_v37 = vadd.f32 0.0036580483, %v65_v34 }
  0xad   :  { %v78_v38 = vmul.f32 %v77_v36, %v62_v29  ;;  %v67_v40 = vmul.f32 %v66_v37, %v62_v29 }
  0xaf   :  { %v79_v39 = vadd.f32 0.112945676, %v78_v38  ;;  %v68_v43 = vadd.f32 0.05243302, %v67_v40 }
  0xb1   :  { %v80_v41 = vmul.f32 %v79_v39, %v62_v29  ;;  %v69_v46 = vmul.f32 %v68_v43, %v62_v29 }
  0xb3   :  { %v81_v42 = vadd.f32 0.4994258, %v80_v41  ;;  %v70_v47 = vadd.f32 0.18741608, %v69_v46 }
  0xb5   :  { %v82_v44 = vmul.f32 %v81_v42, %v62_v29  ;;  %v71_v49 = vmul.f32 %v70_v47, %v62_v29 }
  0xb7   :  { %v83_v45 = vadd.f32 1.0, %v82_v44  ;;  %v72_v53 = vadd.f32 1.1283791, %v71_v49 }
  0xb9   :  { %177 = vrcp.f32 %v83_v45  ;;  %v95_v52 = vand.u32 2147483648, %v83_v45  ;;  %v93_v55 = vand.u32 2147483647, %v83_v45  ;;  %vm89_vm5 = vweird.f32 %v83_v45 }
  0xba   :  { %v73_v58 = vmul.f32 %v72_v53, %v60_v27 }
  0xbb   :  { %v96_v57 = vor.u32 1.1754944e-38, %v95_v52  ;;  %vm94_vm7 = vcmp.eq.f32.partialorder %v93_v55, 8.507059e+37 }
  0xbf   :  { %v178_v48 = vpop.eup %177 }
  0xc0   :  { %v85_v50 = vmul.f32 %v178_v48, %v83_v45  ;;  %vm90_vm4 = vweird.f32 %v178_v48 }
  0xc1   :  { %vm91_vm6 = vmor %vm89_vm5, %vm90_vm4 }
  0xc2   :  { %v86_v51 = vsub.f32 1.0, %v85_v50 }
  0xc4   :  { %v87_v54 = vmul.f32 %v178_v48, %v86_v51 }
  0xc6   :  { %v88_v56 = vadd.f32 %v178_v48, %v87_v54 }
  0xc8   :  { %v92_v59 = vsel %vm91_vm6, %v178_v48, %v88_v56 }
  0xc9   :  { %v97_v60 = vsel %vm94_vm7, %v96_v57, %v92_v59 }
  0xca   :  { %v98_v61 = vmul.f32 %v97_v60, %v73_v58 }
  0xcc   :  { %v159_v62 = vclamps-f32 %v98_v61, 1.0 }
  0xce   :  { %v101_v0 = vadd.f32 1.0, %v159_v62 }
  0xd0   :  { %v102_v1 = vmul.f32 %v101_v0, %v59_v63 }
  0xd2   :  { %v103_v2 = vpack.c.bf16 %v102_v1, %v102_v1 }
  0xd4   :  { %168 = vmatmul.msk.bf16.vlgmr.msra.gmra.mxu0 %vm124_vm8, %v103_v2 }
 0x151   :  { %v137_v4 = vpop.f32.mrf.mxu0 }
 0x152   :  { %v138_v5 = vadd.f32 %v174_v3, %v137_v4 }
 0x154   :  { %142 = vst.msk [vmem:[#allocation2] sm:$0xf] %vm141_vm9, %v138_v5 }
 0x155   :  { %153 = dma.vmem_to_hbm [thread:$0]  %s149_s27, 64, %s151_s30, [#allocation3]  }
 0x159   :  { %v139_v6 = vpop.f32.mrf.mxu0 }
 0x15a   :  { %203 = dma.done.wait [#allocation3], 64  }
 0x15b   :  { %204 = vsyncadd [#allocation3], 4294967232 }
 0x15c   :  { %158 = vsyncpa [#allocation3], 1 }

</bundles_post_ra>
